<compile_context>
chip_gen: v6e
topology: v6e:2x2x1
jax: 0.10.0
libtpu: 0.0.40
codegen_flags: <defaults>
</compile_context>

<pallas_src>
from functools import partial

import numpy as np
import jax
import jax.numpy as jnp
from jax.experimental import pallas as pl
from jax.experimental.pallas import tpu as pltpu


def gnet_kernel(x_ref, w1t_ref, b1_ref, w2mu_ref, w2ls_ref,
                bmu_ref, bls_ref, eps_ref, scale_ref, out_ref):
    # Stage 1: Conv1d(1, T*D, kernel=H) == dense matmul (bf16 in, f32 accumulate) + ReLU.
    h = jnp.dot(x_ref[...], w1t_ref[...], preferred_element_type=jnp.float32)
    h = jnp.maximum(h + b1_ref[...], 0.0)                          # (TB, T*D) f32

    # Stage 2: grouped Conv1d(T, 2T, kernel=D, groups=T) == per-tile dot products.
    # VPU multiply + lane reduce over D (=128, lane axis) instead of a mostly-zero
    # block-diagonal matmul.
    T, D = w2mu_ref.shape
    h3 = h.reshape(h.shape[0], T, D)                               # (TB, T, D)
    mu = jnp.sum(h3 * w2mu_ref[...], axis=-1) + bmu_ref[...]       # (TB, T)
    ls = jnp.sum(h3 * w2ls_ref[...], axis=-1) + bls_ref[...]       # (TB, T)

    # Stage 3: reparameterized sample; 2.0 * output_scale pre-folded into scale_ref.
    out_ref[...] = (mu + jnp.exp(ls) * eps_ref[...]) * scale_ref[0]


def prepare_gnet_params(w1, b1, w2, b2, output_scale):
    """One-time weight-side transforms. Do NOT rebuild these per forward call.

    w1: (T*D, 1, H)  Conv1d(1, T*D, kernel=H).weight       b1: (T*D,)
    w2: (2T, 1, D)   Conv1d(T, 2T, kernel=D, groups=T).weight   b2: (2T,)
    """
    TD = w1.shape[0]
    D = w2.shape[-1]
    T = TD // D
    w1t = jnp.transpose(w1[:, 0, :]).astype(jnp.bfloat16)          # (H, T*D) bf16
    b1row = b1.reshape(1, TD).astype(jnp.float32)
    # Even out-channels feed mu (out[:, ::2]), odd feed logsigma (out[:, 1::2]).
    w2mu = w2[0::2, 0, :].astype(jnp.float32)                      # (T, D)
    w2ls = w2[1::2, 0, :].astype(jnp.float32)                      # (T, D)
    bmu = b2[0::2].reshape(1, T).astype(jnp.float32)
    bls = b2[1::2].reshape(1, T).astype(jnp.float32)
    scale = jnp.asarray([2.0 * float(output_scale)], dtype=jnp.float32)
    return dict(w1t=w1t, b1=b1row, w2mu=w2mu, w2ls=w2ls, bmu=bmu, bls=bls,
                scale=scale)


@partial(jax.jit, static_argnames=("batch_tile",))
def fast_stochastic_gnet(x, eps, params, batch_tile=512):
    """x: (B, 1, H) NCL input. eps: (B, T) noise. Returns (B, T, 1) to match PyTorch."""
    B = x.shape[0]
    H = x.shape[-1]
    TD = params["w1t"].shape[1]
    T, D = params["w2mu"].shape

    TB = B if B <= batch_tile else batch_tile
    nb = pl.cdiv(B, TB)

    x2 = x.reshape(B, H).astype(jnp.bfloat16)
    eps2 = eps.reshape(B, T).astype(jnp.float32)

    out2d = pl.pallas_call(
        gnet_kernel,
        out_shape=jax.ShapeDtypeStruct((B, T), jnp.float32),
        grid=(nb,),
        in_specs=[
            pl.BlockSpec((TB, H), lambda i: (i, 0)),       # x tile        (per-step)
            pl.BlockSpec((H, TD), lambda i: (0, 0)),       # w1t           (resident)
            pl.BlockSpec((1, TD), lambda i: (0, 0)),       # b1 row        (resident)
            pl.BlockSpec((T, D), lambda i: (0, 0)),        # w2 mu half    (resident)
            pl.BlockSpec((T, D), lambda i: (0, 0)),        # w2 logsigma   (resident)
            pl.BlockSpec((1, T), lambda i: (0, 0)),        # bias mu row
            pl.BlockSpec((1, T), lambda i: (0, 0)),        # bias logsigma row
            pl.BlockSpec((TB, T), lambda i: (i, 0)),       # eps tile      (per-step)
            pl.BlockSpec(memory_space=pltpu.MemorySpace.SMEM),  # 2*output_scale
        ],
        out_specs=pl.BlockSpec((TB, T), lambda i: (i, 0)),
        compiler_params=pltpu.CompilerParams(
            dimension_semantics=("parallel",)),            # megacore-shardable batch
    )(x2, params["w1t"], params["b1"], params["w2mu"], params["w2ls"],
      params["bmu"], params["bls"], eps2, params["scale"])

    return out2d.reshape(B, T, 1)


if __name__ == "__main__":
    key = jax.random.PRNGKey(0)
    num_tiles = 8
    sizes = [16, 128]          # sizes[0]=H (conv kernel / input length), sizes[1]=D (hidden)
    B = 4
    H, D, T = sizes[0], sizes[1], num_tiles
    TD = T * D

    k1, k2, k3, k4 = jax.random.split(key, 4)

    # Deterministic parameter init (normal std=0.01, zero bias, like init_weights).
    w1 = 0.01 * jax.random.normal(k1, (TD, 1, H), jnp.float32)
    b1 = jnp.zeros((TD,), jnp.float32)
    w2 = 0.01 * jax.random.normal(k2, (2 * T, 1, D), jnp.float32)
    # Literal PyTorch spec: bias.data = repeat_interleave([0, log(0.02)], T), i.e.
    # channels [0..T-1] = 0 and [T..2T-1] = log(0.02). The forward then splits even/odd
    # channels, so the mu / logsigma bias rows each mix both values; we reproduce the
    # literal module code here (not the presumably intended all-0 / all-log split).
    b2 = jnp.concatenate([jnp.zeros((T,), jnp.float32),
                          jnp.full((T,), np.log(0.02, dtype=np.float32))])
    output_scale = 0.5         # detached scalar output_scale

    x = jax.random.normal(k3, (B, 1, H), jnp.float32)      # PyTorch NCL input (B, 1, H)
    eps = jax.random.normal(k4, (B, T), jnp.float32)       # randn_like(logsigma), squeezed

    params = prepare_gnet_params(w1, b1, w2, b2, output_scale)   # weight prep done ONCE
    out = fast_stochastic_gnet(x, eps, params)
    out = jax.block_until_ready(out)

    # Reference 1: same bf16-rounded stage-1 operands, f32 accumulation (tight check).
    x2_bf = x.reshape(B, H).astype(jnp.bfloat16)
    h = jnp.maximum(
        jnp.dot(x2_bf, params["w1t"], preferred_element_type=jnp.float32) + b1, 0.0)
    h3 = h.reshape(B, T, D)
    mu_ref = (h3 * w2[0::2, 0, :]).sum(-1) + b2[0::2]
    ls_ref = (h3 * w2[1::2, 0, :]).sum(-1) + b2[1::2]
    ref = ((mu_ref + jnp.exp(ls_ref) * eps) * 2.0 * output_scale)[..., None]
    np.testing.assert_allclose(np.asarray(out), np.asarray(ref), rtol=1e-5, atol=1e-5)

    # Reference 2: pure-f32 grouped-conv formulation of the original module
    # (bf16 stage-1 operands are an intentional perf trade-off -> looser tolerance).
    h_f32 = jnp.maximum(x.reshape(B, H) @ w1[:, 0, :].T + b1, 0.0).reshape(B, T, D)
    mu_f = (h_f32 * w2[0::2, 0, :]).sum(-1) + b2[0::2]
    ls_f = (h_f32 * w2[1::2, 0, :]).sum(-1) + b2[1::2]
    ref_f32 = ((mu_f + jnp.exp(ls_f) * eps) * 2.0 * output_scale)[..., None]
    np.testing.assert_allclose(np.asarray(out), np.asarray(ref_f32), rtol=5e-2, atol=5e-3)

    print("KERNEL_OK")
</pallas_src>

<mosaic_0001>
module attributes {stable_mosaic.version = 11 : i64} {
  func.func @gnet_kernel(%arg0: i32, %arg1: memref<4x16xbf16, #tpu.memory_space<vmem>>, %arg2: memref<16x1024xbf16, #tpu.memory_space<vmem>>, %arg3: memref<1x1024xf32, #tpu.memory_space<vmem>>, %arg4: memref<8x128xf32, #tpu.memory_space<vmem>>, %arg5: memref<8x128xf32, #tpu.memory_space<vmem>>, %arg6: memref<1x8xf32, #tpu.memory_space<vmem>>, %arg7: memref<1x8xf32, #tpu.memory_space<vmem>>, %arg8: memref<4x8xf32, #tpu.memory_space<vmem>>, %arg9: memref<1xf32, #tpu.memory_space<smem>>, %arg10: memref<4x8xf32, #tpu.memory_space<vmem>>) attributes {dimension_semantics = [#tpu.dimension_semantics<parallel>], iteration_bounds = array<i64: 1>, scalar_prefetch = 0 : i64, scratch_operands = 0 : i64, tpu.core_type = #tpu.core_type<tc>, window_params = [{transform_indices = @transform_0, window_bounds = array<i64: 4, 16>}, {pipeline_mode = #tpu.pipeline_mode<synchronous>, transform_indices = @transform_1, window_bounds = array<i64: 16, 1024>}, {pipeline_mode = #tpu.pipeline_mode<synchronous>, transform_indices = @transform_2, window_bounds = array<i64: 1, 1024>}, {pipeline_mode = #tpu.pipeline_mode<synchronous>, transform_indices = @transform_3, window_bounds = array<i64: 8, 128>}, {pipeline_mode = #tpu.pipeline_mode<synchronous>, transform_indices = @transform_4, window_bounds = array<i64: 8, 128>}, {pipeline_mode = #tpu.pipeline_mode<synchronous>, transform_indices = @transform_5, window_bounds = array<i64: 1, 8>}, {pipeline_mode = #tpu.pipeline_mode<synchronous>, transform_indices = @transform_6, window_bounds = array<i64: 1, 8>}, {transform_indices = @transform_7, window_bounds = array<i64: 4, 8>}, {transform_indices = @transform_8, window_bounds = array<i64: 1>}, {transform_indices = @transform_9, window_bounds = array<i64: 4, 8>}]} {
    %c0 = arith.constant 0 : index
    %c0_0 = arith.constant 0 : index
    %0 = vector.load %arg1[%c0, %c0_0] : memref<4x16xbf16, #tpu.memory_space<vmem>>, vector<4x16xbf16>
    %c0_1 = arith.constant 0 : index
    %c0_2 = arith.constant 0 : index
    %1 = vector.load %arg2[%c0_1, %c0_2] : memref<16x1024xbf16, #tpu.memory_space<vmem>>, vector<16x1024xbf16>
    %cst = arith.constant dense<0.000000e+00> : vector<4x1024xf32>
    %2 = tpu.matmul %0, %1, %cst {dimension_numbers = #tpu.dot_dimension_numbers<[1], [0], [0], [1], [0, 0, 1, 1], [], []>} : vector<4x16xbf16>, vector<16x1024xbf16>, vector<4x1024xf32> -> vector<4x1024xf32>
    %c0_3 = arith.constant 0 : index
    %c0_4 = arith.constant 0 : index
    %3 = vector.load %arg3[%c0_3, %c0_4] : memref<1x1024xf32, #tpu.memory_space<vmem>>, vector<1x1024xf32>
    %4 = vector.broadcast %3 : vector<1x1024xf32> to vector<4x1024xf32>
    %5 = arith.addf %2, %4 : vector<4x1024xf32>
    %cst_5 = arith.constant 0.000000e+00 : f32
    %6 = vector.broadcast %cst_5 : f32 to vector<4x1024xf32>
    %7 = arith.maximumf %5, %6 : vector<4x1024xf32>
    %8 = vector.shape_cast %7 : vector<4x1024xf32> to vector<4x8x128xf32>
    %c0_6 = arith.constant 0 : index
    %c0_7 = arith.constant 0 : index
    %9 = vector.load %arg4[%c0_6, %c0_7] : memref<8x128xf32, #tpu.memory_space<vmem>>, vector<8x128xf32>
    %10 = vector.shape_cast %9 : vector<8x128xf32> to vector<1x8x128xf32>
    %11 = vector.broadcast %10 : vector<1x8x128xf32> to vector<4x8x128xf32>
    %12 = arith.mulf %8, %11 : vector<4x8x128xf32>
    %cst_8 = arith.constant dense<0.000000e+00> : vector<4x8xf32>
    %13 = vector.multi_reduction <add>, %12, %cst_8 [2] : vector<4x8x128xf32> to vector<4x8xf32>
    %c0_9 = arith.constant 0 : index
    %c0_10 = arith.constant 0 : index
    %14 = vector.load %arg6[%c0_9, %c0_10] : memref<1x8xf32, #tpu.memory_space<vmem>>, vector<1x8xf32>
    %15 = vector.broadcast %14 : vector<1x8xf32> to vector<4x8xf32>
    %16 = arith.addf %13, %15 : vector<4x8xf32>
    %c0_11 = arith.constant 0 : index
    %c0_12 = arith.constant 0 : index
    %17 = vector.load %arg5[%c0_11, %c0_12] : memref<8x128xf32, #tpu.memory_space<vmem>>, vector<8x128xf32>
    %18 = vector.shape_cast %17 : vector<8x128xf32> to vector<1x8x128xf32>
    %19 = vector.broadcast %18 : vector<1x8x128xf32> to vector<4x8x128xf32>
    %20 = arith.mulf %8, %19 : vector<4x8x128xf32>
    %cst_13 = arith.constant dense<0.000000e+00> : vector<4x8xf32>
    %21 = vector.multi_reduction <add>, %20, %cst_13 [2] : vector<4x8x128xf32> to vector<4x8xf32>
    %c0_14 = arith.constant 0 : index
    %c0_15 = arith.constant 0 : index
    %22 = vector.load %arg7[%c0_14, %c0_15] : memref<1x8xf32, #tpu.memory_space<vmem>>, vector<1x8xf32>
    %23 = vector.broadcast %22 : vector<1x8xf32> to vector<4x8xf32>
    %24 = arith.addf %21, %23 : vector<4x8xf32>
    %25 = math.exp %24 : vector<4x8xf32>
    %c0_16 = arith.constant 0 : index
    %c0_17 = arith.constant 0 : index
    %26 = vector.load %arg8[%c0_16, %c0_17] : memref<4x8xf32, #tpu.memory_space<vmem>>, vector<4x8xf32>
    %27 = arith.mulf %25, %26 : vector<4x8xf32>
    %28 = arith.addf %16, %27 : vector<4x8xf32>
    %c0_18 = arith.constant 0 : index
    %29 = memref.load %arg9[%c0_18] : memref<1xf32, #tpu.memory_space<smem>>
    %30 = vector.broadcast %29 : f32 to vector<4x8xf32>
    %31 = arith.mulf %28, %30 : vector<4x8xf32>
    %c0_19 = arith.constant 0 : index
    %c0_20 = arith.constant 0 : index
    %32 = vector.load %arg10[%c0_19, %c0_20] : memref<4x8xf32, #tpu.memory_space<vmem>>, vector<4x8xf32>
    tpu.vector_store %arg10[%c0_19, %c0_20], %31 {strides = array<i32>} : memref<4x8xf32, #tpu.memory_space<vmem>>, vector<4x8xf32>,
    return
  }
  func.func @transform_0(%arg0: i32) -> (i32, i32) {
    %c0_i32 = arith.constant 0 : i32
    %c0_i32_0 = arith.constant 0 : i32
    return %arg0, %c0_i32 : i32, i32
  }
  func.func @transform_1(%arg0: i32) -> (i32, i32) {
    %c0_i32 = arith.constant 0 : i32
    %c0_i32_0 = arith.constant 0 : i32
    %c0_i32_1 = arith.constant 0 : i32
    return %c0_i32, %c0_i32_0 : i32, i32
  }
  func.func @transform_2(%arg0: i32) -> (i32, i32) {
    %c0_i32 = arith.constant 0 : i32
    %c0_i32_0 = arith.constant 0 : i32
    %c0_i32_1 = arith.constant 0 : i32
    return %c0_i32, %c0_i32_0 : i32, i32
  }
  func.func @transform_3(%arg0: i32) -> (i32, i32) {
    %c0_i32 = arith.constant 0 : i32
    %c0_i32_0 = arith.constant 0 : i32
    %c0_i32_1 = arith.constant 0 : i32
    return %c0_i32, %c0_i32_0 : i32, i32
  }
  func.func @transform_4(%arg0: i32) -> (i32, i32) {
    %c0_i32 = arith.constant 0 : i32
    %c0_i32_0 = arith.constant 0 : i32
    %c0_i32_1 = arith.constant 0 : i32
    return %c0_i32, %c0_i32_0 : i32, i32
  }
  func.func @transform_5(%arg0: i32) -> (i32, i32) {
    %c0_i32 = arith.constant 0 : i32
    %c0_i32_0 = arith.constant 0 : i32
    %c0_i32_1 = arith.constant 0 : i32
    return %c0_i32, %c0_i32_0 : i32, i32
  }
  func.func @transform_6(%arg0: i32) -> (i32, i32) {
    %c0_i32 = arith.constant 0 : i32
    %c0_i32_0 = arith.constant 0 : i32
    %c0_i32_1 = arith.constant 0 : i32
    return %c0_i32, %c0_i32_0 : i32, i32
  }
  func.func @transform_7(%arg0: i32) -> (i32, i32) {
    %c0_i32 = arith.constant 0 : i32
    %c0_i32_0 = arith.constant 0 : i32
    return %arg0, %c0_i32 : i32, i32
  }
  func.func @transform_8(%arg0: i32) -> i32 {
    %c0_i32 = arith.constant 0 : i32
    %c0_i32_0 = arith.constant 0 : i32
    return %c0_i32 : i32
  }
  func.func @transform_9(%arg0: i32) -> (i32, i32) {
    %c0_i32 = arith.constant 0 : i32
    %c0_i32_0 = arith.constant 0 : i32
    return %arg0, %c0_i32 : i32, i32
  }
}

</mosaic_0001>

<bundles_post_ra>
// kernel: fast_stochastic_gnet.1
= control target key start
LH: loop header
LB: loop body
LE: loop exit
PB: predicated region body
PF: predicated region fallthrough
CT: control target
= control target key end

     0   :  { %15 = vsyncpa [#allocation4], 0  ;;  %s817_s0 = inlined_call_operand.vmem [shape: bf16[4,16], index: 0, kind: input, shape index: {}]   ;;  %s818_s1 = inlined_call_operand.hbm [shape: bf16[16,1024], index: 1, kind: input, shape index: {}]   ;;  %s819_s2 = inlined_call_operand.vmem [shape: f32[1,1024], index: 2, kind: input, shape index: {}]   ;;  %s820_s3 = inlined_call_operand.vmem [shape: f32[8,128], index: 3, kind: input, shape index: {}]   ;;  %s821_s4 = inlined_call_operand.vmem [shape: f32[8,128], index: 4, kind: input, shape index: {}]   ;;  %s822_s5 = inlined_call_operand.vmem [shape: f32[1,8], index: 5, kind: input, shape index: {}]   ;;  %s823_s6 = inlined_call_operand.hbm [shape: f32[1,8], index: 6, kind: input, shape index: {}]   ;;  %s824_s7 = inlined_call_operand.hbm [shape: f32[4,8], index: 7, kind: input, shape index: {}]   ;;  %s825_s8 = inlined_call_operand.<no memory space> [shape: f32[1], index: 8, kind: input, shape index: {}]   ;;  %s826_s9 = inlined_call_operand.hbm [shape: f32[4,8], index: 9, kind: output, shape index: {}]  }
   0x1   :  { %16 = vsyncpa [#allocation7], 0 }
   0x2   :  { %17 = vsyncpa [#allocation5], 0  ;;  %s695_s30 = smov [#allocation6]   ;;  %s696_s11 = smov [#allocation3]  }
   0x3   :  { %s46_s10 = sshll.u32 %s695_s30, 4  ;;  %s25_s12 = sshll.u32 %s696_s11, 4  ;;  %s47_s10 = int_to_ptr.vmem [resolvable:$true] %s46_s10  ;;  %s26_s12 = int_to_ptr.vmem [resolvable:$true] %s25_s12 }
   0x4   :  { %s617_s13 = scalar_lea.vmem %s47_s10, 16  ;;  %s621_s14 = scalar_lea.vmem %s47_s10, 32 }
   0x5   :  { %p618_p0 = scmp.ne.s32.totalorder %s47_s10, %s617_s13  ;;  %p622_p1 = scmp.lt.s32.totalorder %s47_s10, %s47_s10 }
   0x6   :  { %p623_p2 = scmp.lt.s32.totalorder %s621_s14, %s617_s13 }
   0x8   :  { %p624_p3 = por %p623_p2, %p622_p1 }
   0xa   :  { %p625_p4 = pnand %p624_p3, %p618_p0 }
   0xc   :  { %628 = shalt.err (!%p625_p4)
}
   0xd   :  { %49 = dma.hbm_to_vmem [thread:$0]  %s823_s6, 16, %s47_s10, [#allocation7]  }
   0xe   :  { %s637_s17 = scalar_lea.vmem %s26_s12, 1024  ;;  %p642_p6 = scmp.lt.s32.totalorder %s26_s12, %s26_s12 }
   0xf   :  { %p638_p5 = scmp.ne.s32.totalorder %s26_s12, %s637_s17  ;;  %p643_p7 = scmp.lt.s32.totalorder %s637_s17, %s637_s17 }
  0x11   :  { %p644_p8 = por %p643_p7, %p642_p6 }
  0x13   :  { %p645_p9 = pnand %p644_p8, %p638_p5 }
  0x15   :  { %648 = shalt.err (!%p645_p9)
}
  0x16   :  { %s697_s18 = smov 512   ;;  %s698_s19 = smov 32  }
  0x17   :  { %31 = dma.hbm_to_vmem [thread:$0]  %s818_s1, 1024, %s26_s12, [#allocation4], %s697_s18, %s697_s18, %s698_s19  }
  0x18   :  { %s699_s22 = smov [#allocation8]  }
  0x19   :  { %s56_s23 = sshll.u32 %s699_s22, 4  ;;  %s57_s23 = int_to_ptr.vmem [resolvable:$true] %s56_s23 }
  0x1a   :  { %s657_s24 = scalar_lea.vmem %s57_s23, 64  ;;  %p662_p11 = scmp.lt.s32.totalorder %s57_s23, %s57_s23 }
  0x1b   :  { %p658_p10 = scmp.ne.s32.totalorder %s57_s23, %s657_s24  ;;  %p663_p12 = scmp.lt.s32.totalorder %s657_s24, %s657_s24 }
  0x1d   :  { %p664_p13 = por %p663_p12, %p662_p11 }
  0x1f   :  { %p665_p0 = pnand %p664_p13, %p658_p10 }
  0x21   :  { %668 = shalt.err (!%p665_p0)
}
  0x22   :  { %59 = dma.hbm_to_vmem [thread:$0]  %s824_s7, 64, %s57_s23, [#allocation7]  }
  0x23   :  { %689 = dma.done.wait [#allocation4], 1024  }
  0x24   :  { %690 = vsyncadd [#allocation4], 4294966272 }
  0x25   :  { %691 = dma.done.wait [#allocation7], 80  }
  0x26   :  { %692 = vsyncadd [#allocation7], 4294967216  ;;  %v700_v0 = vmov 0   ;;  %v83_v1 = vlaneseq  ;;  %v73_v3 = vld [vmem:[#allocation3] sm:$0xff]  ;;  %v74_v5 = vld [vmem:[#allocation3 + $0x8] sm:$0xff]  ;;  %vm163_vm0 = vcmask 130048  }
  0x27   :  { %199 = vmatprep.mubr.bf16.mxu0 %v700_v0  ;;  %240 = vmatprep.mubr.bf16.mxu1 %v700_v0  ;;  %v77_v4 = vld [vmem:[#allocation3 + $0x20] sm:$0xff]  ;;  %v78_v7 = vld [vmem:[#allocation3 + $0x28] sm:$0xff]  ;;  %v75_v9 = vld [vmem:[#allocation3 + $0x10] sm:$0xff]  ;;  %v701_v39 = vmov 1983009808   ;;  %vm551_vm1 = vcmask 1041409  }
  0x28   :  { %599 = vset.pattern.permute.xlu0 %v700_v0  ;;  %600 = vset.pattern.permute.xlu1 %v700_v0  ;;  %v764_v2 = vshrl.u32 %v83_v1, 7  ;;  %v577_v6 = vcombine.high %v73_v3, %v77_v4  ;;  %v576_v8 = vcombine.low %v73_v3, %v77_v4  ;;  %v579_v10 = vcombine.high %v74_v5, %v78_v7  ;;  %v79_v12 = vld [vmem:[#allocation3 + $0x30] sm:$0xff]  ;;  %v76_v13 = vld [vmem:[#allocation3 + $0x18] sm:$0xff]  ;;  %v589_v18 = vld [vmem:[#allocation6] ss:$0 sm:$0xff] }
  0x29   :  { %v578_v11 = vcombine.low %v74_v5, %v78_v7  ;;  %v80_v14 = vld [vmem:[#allocation3 + $0x38] sm:$0xff]  ;;  %v581_v16 = vcombine.high %v75_v9, %v79_v12  ;;  %v767_v19 = vld [vmem:[#allocation8] sm:$0xf]  ;;  %v72_v20 = vld [vmem:[%s817_s0] sm:$0x3]  ;;  %v580_v21 = vcombine.low %v75_v9, %v79_v12  ;;  %454 = vbcast.lane.b32.xlu0 %v589_v18, 256  ;;  %v341_v40 = vunpack.c.l.s4 %v701_v39 }
  0x2a   :  { %v85_v15 = vsub.s32 0, %v764_v2  ;;  %181 = vmatprep.subr.bf16.mxu0 %v577_v6  ;;  %v583_v17 = vcombine.high %v76_v13, %v80_v14  ;;  %222 = vmatprep.subr.bf16.mxu1 %v579_v10  ;;  %v588_v22 = vld [vmem:[%s822_s5] ss:$0 sm:$0xff]  ;;  %v582_v23 = vcombine.low %v76_v13, %v80_v14  ;;  %v89_v25 = vsub.s32 1, %v764_v2 }
  0x2b   :  { %182 = vmatpush1.bf16.msra.mxu0 %v576_v8  ;;  %223 = vmatpush1.bf16.msra.mxu1 %v578_v11  ;;  %v93_v27 = vsub.s32 2, %v764_v2  ;;  %v97_v28 = vsub.s32 3, %v764_v2  ;;  %v81_v29 = vld [vmem:[%s819_s2] sm:$0xff]  ;;  %v101_v36 = vsub.s32 4, %v764_v2  ;;  %v109_v38 = vsub.s32 6, %v764_v2 }
  0x2c   :  { %263 = vmatprep.subr.bf16.mxu0 %v581_v16  ;;  %304 = vmatprep.subr.bf16.mxu1 %v583_v17  ;;  %v474_v24 = vrot.slane %v767_v19, %v85_v15  ;;  %v481_v26 = vrot.slane %v767_v19, %v89_v25  ;;  %v90_v30 = vrot.slane %v81_v29, %v89_v25  ;;  %v105_v43 = vsub.s32 5, %v764_v2  ;;  %v434_v39 = vld [vmem:[%s821_s4] sm:$0xff] }
  0x2d   :  { %427 = vbcast.lane.b32.xlu1 %v588_v22, 256  ;;  %v86_v31 = vrot.slane %v81_v29, %v85_v15  ;;  %v94_v33 = vrot.slane %v81_v29, %v93_v27  ;;  %v98_v34 = vrot.slane %v81_v29, %v97_v28  ;;  %v113_v48 = vsub.s32 7, %v764_v2 }
  0x2e   :  { %584 = vmatmul.mubr.msk.bf16.vlgmr.msra.gmra.mxu0 %vm163_vm0, %v72_v20  ;;  %585 = vmatmul.mubr.msk.bf16.vlgmr.msra.gmra.mxu1 %vm163_vm0, %v72_v20  ;;  %v102_v50 = vrot.slane %v81_v29, %v101_v36  ;;  %v110_v54 = vrot.slane %v81_v29, %v109_v38  ;;  %v106_v56 = vrot.slane %v81_v29, %v105_v43  ;;  %v342_v59 = vunpack.c.0.s8 %v341_v40 }
  0x2f   :  { %264 = vmatpush1.bf16.msra.mxu0 %v580_v21  ;;  %305 = vmatpush1.bf16.msra.mxu1 %v582_v23  ;;  %v114_v61 = vrot.slane %v81_v29, %v113_v48  ;;  %v407_v48 = vld [vmem:[%s820_s3] sm:$0xff]  ;;  %vm553_vm2 = vcmask 1042434   ;;  %vm555_vm3 = vcmask 1043459   ;;  %vm558_vm4 = vcmask 60416  }
  0x30   :  { %281 = vmatprep.mubr.bf16.mxu0 %v700_v0  ;;  %322 = vmatprep.mubr.bf16.mxu1 %v700_v0  ;;  %v702_v0 = vmov 1934713408   ;;  %v345_v11 = vsub.s32 %v342_v59, %v764_v2 }
  0x31   :  { %476 = vbcast.lane.b32.xlu0 %v474_v24, 256  ;;  %v374_v3 = vunpack.c.l.s4 %v702_v0 }
  0x33   :  { %v375_v17 = vunpack.c.0.s8 %v374_v3 }
  0x35   :  { %483 = vbcast.lane.b32.xlu0 %v481_v26, 256  ;;  %v378_v26 = vsub.s32 %v375_v17, %v764_v2 }
  0x36   :  { %586 = vmatmul.mubr.msk.bf16.vlgmr.msra.gmra.mxu0 %vm163_vm0, %v72_v20  ;;  %587 = vmatmul.mubr.msk.bf16.vlgmr.msra.gmra.mxu1 %vm163_vm0, %v72_v20 }
  0xee   :  { %v201_v32 = vpop.f32.mrf.mxu0  ;;  %v242_v35 = vpop.f32.mrf.mxu1 }
  0xef   :  { %v202_v44 = vadd.f32 %v201_v32, %v86_v31  ;;  %v243_v45 = vadd.f32 %v242_v35, %v94_v33 }
  0xf0   :  { %v203_v37 = vpop.f32.mrf.mxu0  ;;  %v244_v42 = vpop.f32.mrf.mxu1 }
  0xf1   :  { %v204_v41 = vadd.f32 %v203_v37, %v90_v30  ;;  %v245_v46 = vadd.f32 %v244_v42, %v98_v34  ;;  %v331_v57 = vmax.f32 %v202_v44, 0.0  ;;  %v333_v58 = vmax.f32 %v243_v45, 0.0 }
  0xf2   :  { %v205_v47 = vpop.f32.mrf.mxu0  ;;  %v246_v49 = vpop.f32.mrf.mxu1 }
  0xf3   :  { %v332_v51 = vmax.f32 %v204_v41, 0.0  ;;  %v334_v52 = vmax.f32 %v245_v46, 0.0  ;;  %v339_v10 = vcombine.low %v331_v57, %v333_v58  ;;  %v428_v57 = vpop.permute.xlu1 %427 }
  0xf4   :  { %v206_v53 = vpop.f32.mrf.mxu0  ;;  %v247_v55 = vpop.f32.mrf.mxu1 }
  0xf5   :  { %v347_v4 = vcombine.low %v332_v51, %v334_v52  ;;  %v346_v24 = vrot.slane %v339_v10, %v345_v11  ;;  %v488_v53 = vrot.slane %v767_v19, %v93_v27  ;;  %v455_v55 = vpop.permute.xlu0 %454 }
  0xf6   :  { %v283_v60 = vpop.f32.mrf.mxu0  ;;  %v324_v63 = vpop.f32.mrf.mxu1 }
  0xf7   :  { %v284_v62 = vadd.f32 %v283_v60, %v102_v50  ;;  %v325_v5 = vadd.f32 %v324_v63, %v110_v54  ;;  %v354_v18 = vrot.slane %v347_v4, %v345_v11  ;;  %v495_v54 = vrot.slane %v767_v19, %v97_v28 }
  0xf8   :  { %v285_v6 = vpop.f32.mrf.mxu0  ;;  %v326_v9 = vpop.f32.mrf.mxu1 }
  0xf9   :  { %v335_v7 = vmax.f32 %v284_v62, 0.0  ;;  %v286_v8 = vadd.f32 %v285_v6, %v106_v56  ;;  %v337_v12 = vmax.f32 %v325_v5, 0.0  ;;  %v327_v13 = vadd.f32 %v326_v9, %v114_v61  ;;  %v477_v56 = vpop.permute.xlu0 %476 }
  0xfa   :  { %v287_v14 = vpop.f32.mrf.mxu0  ;;  %v328_v16 = vpop.f32.mrf.mxu1  ;;  %v371_v29 = vcombine.low %v346_v24, %v354_v18  ;;  %v372_v30 = vcombine.high %v346_v24, %v354_v18 }
  0xfb   :  { %v336_v15 = vmax.f32 %v286_v8, 0.0  ;;  %v355_v20 = vcombine.low %v335_v7, %v337_v12  ;;  %v338_v21 = vmax.f32 %v327_v13, 0.0 }
  0xfc   :  { %v288_v22 = vpop.f32.mrf.mxu0  ;;  %v329_v23 = vpop.f32.mrf.mxu1  ;;  %v386_v35 = vrot.slane %v372_v30, %v378_v26  ;;  %v379_v37 = vrot.slane %v371_v29, %v378_v26 }
  0xfd   :  { %v363_v25 = vcombine.low %v336_v15, %v338_v21  ;;  %v362_v31 = vrot.slane %v355_v20, %v345_v11  ;;  %v484_v58 = vpop.permute.xlu0 %483  ;;  %v512_v15 = vstv %s825_s8  ;;  %s703_s8 = smov [#allocation9]  }
  0xfe   :  { %s566_s10 = sshll.u32 %s703_s8, 4  ;;  %s567_s10 = int_to_ptr.vmem [resolvable:$true] %s566_s10 }
  0xff   :  { %v370_v32 = vrot.slane %v363_v25, %v345_v11  ;;  %s669_s11 = scalar_lea.vmem %s567_s10, 64  ;;  %p674_p2 = scmp.lt.s32.totalorder %s567_s10, %s567_s10 }
 0x100   :  { %p670_p1 = scmp.ne.s32.totalorder %s567_s10, %s669_s11  ;;  %p675_p3 = scmp.lt.s32.totalorder %s669_s11, %s669_s11 }
 0x101   :  { %v387_v33 = vcombine.low %v362_v31, %v370_v32  ;;  %v388_v34 = vcombine.high %v362_v31, %v370_v32 }
 0x102   :  { %p676_p4 = por %p675_p3, %p674_p2 }
 0x103   :  { %v402_v36 = vrot.slane %v388_v34, %v378_v26  ;;  %v395_v38 = vrot.slane %v387_v33, %v378_v26 }
 0x104   :  { %p677_p5 = pnand %p676_p4, %p670_p1 }
 0x105   :  { %v405_v40 = vcombine.low %v386_v35, %v402_v36  ;;  %v403_v41 = vcombine.low %v379_v37, %v395_v38  ;;  %v406_v44 = vcombine.high %v386_v35, %v402_v36  ;;  %v404_v45 = vcombine.high %v379_v37, %v395_v38 }
 0x106   :  { %v534_v36 = vand.u32 127, %v83_v1 }
 0x107   :  { %v437_v42 = vmul.f32 %v434_v39, %v405_v40  ;;  %v435_v43 = vmul.f32 %v434_v39, %v403_v41  ;;  %v438_v46 = vmul.f32 %v434_v39, %v406_v44  ;;  %v436_v47 = vmul.f32 %v434_v39, %v404_v45 }
 0x108   :  { %v408_v49 = vmul.f32 %v407_v48, %v403_v41  ;;  %v409_v50 = vmul.f32 %v407_v48, %v404_v45  ;;  %v410_v51 = vmul.f32 %v407_v48, %v405_v40  ;;  %v411_v52 = vmul.f32 %v407_v48, %v406_v44 }
 0x109   :  { %443 = vadd.xlane.f32.xlu1 %v437_v42  ;;  %439 = vadd.xlane.f32.xlu0 %v435_v43  ;;  %v537_v38 = vsub.s32 %v534_v36, %v764_v2 }
 0x10d   :  { %445 = vadd.xlane.f32.xlu1 %v438_v46  ;;  %441 = vadd.xlane.f32.xlu0 %v436_v47 }
 0x111   :  { %412 = vadd.xlane.f32.xlu1 %v408_v49 }
 0x115   :  { %414 = vadd.xlane.f32.xlu1 %v409_v50 }
 0x119   :  { %416 = vadd.xlane.f32.xlu1 %v410_v51 }
 0x11d   :  { %418 = vadd.xlane.f32.xlu1 %v411_v52 }
 0x123   :  { %490 = vbcast.lane.b32.xlu0 %v488_v53, 256 }
 0x12e   :  { %497 = vbcast.lane.b32.xlu1 %v495_v54, 256 }
 0x192   :  { %v444_v59 = vpop.xlane.xlu1 %443  ;;  %v440_v60 = vpop.xlane.xlu0 %439 }
 0x193   :  { %v459_v61 = vadd.f32 %v455_v55, %v444_v59  ;;  %v457_v62 = vadd.f32 %v455_v55, %v440_v60 }
 0x195   :  { %v461_v63 = vmul.f32 1.442695, %v457_v62  ;;  %v465_v0 = vmul.f32 1.442695, %v459_v61 }
 0x196   :  { %v446_v3 = vpop.xlane.xlu1 %445  ;;  %v442_v4 = vpop.xlane.xlu0 %441 }
 0x197   :  { %v460_v5 = vadd.f32 %v455_v55, %v446_v3  ;;  %v458_v27 = vadd.f32 %v455_v55, %v442_v4  ;;  %601 = vpow2.f32 %v461_v63 }
 0x198   :  { %603 = vpow2.f32 %v465_v0 }
 0x199   :  { %v467_v6 = vmul.f32 1.442695, %v460_v5  ;;  %v463_v7 = vmul.f32 1.442695, %v458_v27 }
 0x19a   :  { %v413_v19 = vpop.xlane.xlu1 %412  ;;  %v491_v14 = vpop.permute.xlu0 %490 }
 0x19b   :  { %605 = vpow2.f32 %v463_v7  ;;  %v430_v11 = vadd.f32 %v428_v57, %v413_v19 }
 0x19c   :  { %607 = vpow2.f32 %v467_v6 }
 0x19e   :  { %v415_v28 = vpop.xlane.xlu1 %414 }
 0x19f   :  { %v431_v21 = vadd.f32 %v428_v57, %v415_v28 }
 0x1a2   :  { %v417_v8 = vpop.xlane.xlu1 %416 }
 0x1a3   :  { %v432_v30 = vadd.f32 %v428_v57, %v417_v8 }
 0x1a4   :  { %v602_v9 = vpop.eup %601 }
 0x1a5   :  { %v503_v10 = vmul.f32 %v602_v9, %v477_v56  ;;  %v604_v13 = vpop.eup %603 }
 0x1a6   :  { %v419_v12 = vpop.xlane.xlu1 %418  ;;  %v505_v22 = vmul.f32 %v604_v13, %v491_v14 }
 0x1a7   :  { %v507_v16 = vadd.f32 %v503_v10, %v430_v11  ;;  %v433_v25 = vadd.f32 %v428_v57, %v419_v12 }
 0x1a8   :  { %v606_v17 = vpop.eup %605  ;;  %v509_v32 = vadd.f32 %v505_v22, %v432_v30 }
 0x1a9   :  { %v608_v18 = vpop.eup %607  ;;  %v504_v20 = vmul.f32 %v606_v17, %v484_v58  ;;  %v513_v24 = vmul.f32 %v512_v15, %v507_v16 }
 0x1aa   :  { %v498_v23 = vpop.permute.xlu1 %497  ;;  %v515_v35 = vmul.f32 %v512_v15, %v509_v32 }
 0x1ab   :  { %v506_v26 = vmul.f32 %v608_v18, %v498_v23  ;;  %v508_v29 = vadd.f32 %v504_v20, %v431_v21  ;;  %522 = vperm.xlu0 %599, %v513_v24  }
 0x1ad   :  { %v510_v31 = vadd.f32 %v506_v26, %v433_v25  ;;  %v514_v33 = vmul.f32 %v512_v15, %v508_v29 }
 0x1af   :  { %v516_v34 = vmul.f32 %v512_v15, %v510_v31  ;;  %525 = vperm.xlu1 %600, %v514_v33  }
 0x1b1   :  { %531 = vperm.xlu0 %599, %v516_v34  }
 0x1b3   :  { %528 = vperm.xlu1 %600, %v515_v35  }
 0x226   :  { %v523_v37 = vpop.permute.xlu0 %522 }
 0x227   :  { %v538_v42 = vrot.slane %v523_v37, %v537_v38 }
 0x22a   :  { %v526_v39 = vpop.permute.xlu1 %525 }
 0x22b   :  { %v542_v40 = vrot.slane %v526_v39, %v537_v38 }
 0x22c   :  { %v532_v41 = vpop.permute.xlu0 %531 }
 0x22d   :  { %v552_v45 = vsel %vm551_vm1, %v542_v40, %v538_v42  ;;  %v550_v46 = vrot.slane %v532_v41, %v537_v38 }
 0x22e   :  { %v529_v43 = vpop.permute.xlu1 %528 }
 0x22f   :  { %v546_v44 = vrot.slane %v529_v43, %v537_v38 }
 0x231   :  { %v554_v47 = vsel %vm553_vm2, %v546_v44, %v552_v45 }
 0x232   :  { %v556_v1 = vsel %vm555_vm3, %v550_v46, %v554_v47 }
 0x233   :  { %559 = vst.msk [vmem:[#allocation9] sm:$0xf] %vm558_vm4, %v556_v1 }
 0x234   :  { %680 = shalt.err (!%p677_p5)
}
 0x235   :  { %569 = dma.vmem_to_hbm [thread:$0]  %s567_s10, 64, %s826_s9, [#allocation5]  }
 0x236   :  { %693 = dma.done.wait [#allocation5], 64  }
 0x237   :  { %694 = vsyncadd [#allocation5], 4294967232 }
 0x238   :  { %573 = vsyncpa [#allocation4], 1 }
 0x239   :  { %574 = vsyncpa [#allocation7], 1 }
 0x23a   :  { %575 = vsyncpa [#allocation5], 1 }

</bundles_post_ra>
